<compile_context>
chip_gen: v5e
topology: v5e:2x2
jax: 0.10.0
libtpu: 0.0.40
codegen_flags: <defaults>
</compile_context>

<pallas_src>
import functools

import jax
import jax.numpy as jnp
from jax.experimental import pallas as pl
from jax.experimental.pallas import tpu as pltpu


def _round_up(x, m):
    return ((x + m - 1) // m) * m


def _focal_loss_kernel(alpha_ref, t_ref, x_ref, out_ref, *, gamma):
    # alpha_ref: (1, C)       per-class alpha weights (whole array, constant)
    # t_ref:     (TILE_N, 1)  int32 target class per row
    # x_ref:     (TILE_N, C)  logits in native dtype (cast per tile, not in HBM)
    # out_ref:   (1, TILE_N)  per-row loss, lane-dense
    x = x_ref[...].astype(jnp.float32)
    t = t_ref[...]
    alpha_row = alpha_ref[...].astype(jnp.float32)

    tn, c = x.shape

    # one-hot predicate (scatter_ equivalent), rows on sublanes
    col = jax.lax.broadcasted_iota(jnp.int32, (tn, c), 1)
    onehot = col == t                                       # (TILE_N, C) bool

    # numerically stable log-softmax pieces; the row max stays sublane
    # oriented and is only used to shift x before exp (lane broadcast).
    m = jnp.max(x, axis=1, keepdims=True)                   # (TILE_N, 1)
    xm = x - m                                              # (TILE_N, C), <= 0
    e = jnp.exp(xm)                                         # (TILE_N, C)
    sel = jnp.where(onehot, xm, 0.0)                        # x[target]-m at target
    oh = jnp.where(onehot, 1.0, 0.0)                        # (TILE_N, C) f32

    # Per-row scalars produced directly lane-major ((1, TILE_N)) by contracting
    # the class axis on the otherwise-idle MXU: no sublane->lane relayout, and
    # the output store stays lane-dense.  HIGHEST precision keeps the f32
    # contractions exact enough for a tight match against the softmax reference.
    ones_row = jnp.ones((1, c), jnp.float32)
    dn = (((1,), (1,)), ((), ()))                           # contract last dims
    prec = jax.lax.Precision.HIGHEST
    sum_e = jax.lax.dot_general(ones_row, e, dn, precision=prec,
                                preferred_element_type=jnp.float32)   # (1, TILE_N)
    xt_m = jax.lax.dot_general(ones_row, sel, dn, precision=prec,
                               preferred_element_type=jnp.float32)    # (1, TILE_N)
    alpha_i = jax.lax.dot_general(alpha_row, oh, dn, precision=prec,
                                  preferred_element_type=jnp.float32)  # (1, TILE_N)

    log_p = xt_m - jnp.log(sum_e)                           # (1, TILE_N)
    p = jnp.exp(log_p)
    one_minus_p = 1.0 - p

    # (1 - p)^gamma: repeated multiply for small integer gamma (VPU only,
    # avoids exp(gamma*log(x)) and its log(0) hazard).
    g = float(gamma)
    if g == int(g) and 0 <= int(g) <= 4:
        focal = jnp.ones_like(one_minus_p)
        for _ in range(int(g)):
            focal = focal * one_minus_p
    else:
        focal = jnp.power(one_minus_p, g)

    out_ref[...] = (-alpha_i * focal * log_p).astype(out_ref.dtype)


def focal_loss(inputs, targets, alpha=None, gamma=2.0, reduction="none",
               tile_n=None, vmem_budget_bytes=20 * 1024 * 1024):
    """inputs: (N, C) float logits (any float dtype); targets: (N,) int classes."""
    n, c = inputs.shape
    x = jnp.asarray(inputs)                                  # keep native dtype
    targets2d = jnp.asarray(targets, jnp.int32).reshape(n, 1)
    if alpha is None:
        alpha = jnp.ones((c,), dtype=jnp.float32)            # torch.ones(class_num, 1)
    alpha2d = jnp.asarray(alpha, jnp.float32).reshape(1, c)

    itemsize = jnp.dtype(x.dtype).itemsize

    # ---- tile size ---------------------------------------------------------
    if tile_n is None:
        # Per-row, double-buffered VMEM: logits block (c*itemsize B), the
        # lane-padded (tile,1) int32 targets block (~512 B), the (1,tile) f32
        # output block (~32 B incl. sublane padding), plus ~8 in-body f32
        # (tile, C) temporaries.
        per_row = 2 * (c * itemsize + 512 + 32) + 8 * c * 4
        t = int(vmem_budget_bytes // per_row)
        tile_n = max(128, min(t, 16384))
        # Keep several tiles per chip: feeds both v7x TensorCores (megacore)
        # and keeps the double-buffered pipeline full on every generation.
        tile_n = min(tile_n, max(128, _round_up(pl.cdiv(n, 8), 128)))
    tile_n = int(tile_n)

    if tile_n >= n:
        tile_n = n                                           # single full-array block
        num_tiles = 1
    else:
        tile_n = max(128, (tile_n // 128) * 128)             # lane-aligned blocks
        if tile_n >= n:
            tile_n = n
            num_tiles = 1
        else:
            num_tiles = pl.cdiv(n, tile_n)                   # non-divisible grid OK

    padded_n = num_tiles * tile_n

    kernel = functools.partial(_focal_loss_kernel, gamma=float(gamma))

    out = pl.pallas_call(
        kernel,
        out_shape=jax.ShapeDtypeStruct((1, padded_n), jnp.float32),
        grid_spec=pltpu.PrefetchScalarGridSpec(
            num_scalar_prefetch=0,
            grid=(num_tiles,),
            in_specs=[
                pl.BlockSpec((1, c), lambda i: (0, 0)),        # alpha row (whole)
                pl.BlockSpec((tile_n, 1), lambda i: (i, 0)),   # targets
                pl.BlockSpec((tile_n, c), lambda i: (i, 0)),   # logits, native dtype
            ],
            out_specs=pl.BlockSpec((1, tile_n), lambda i: (0, i)),   # lane-dense
        ),
        compiler_params=pltpu.CompilerParams(
            dimension_semantics=("parallel",),                 # megacore-shard tiles
            vmem_limit_bytes=32 * 1024 * 1024),
        cost_estimate=pl.CostEstimate(
            flops=14 * n * c,
            transcendentals=n * (c + 3),
            bytes_accessed=n * c * itemsize + 8 * n + 4 * padded_n + 4 * c),
    )(alpha2d, targets2d, x)

    batch_loss = out[0, :n].reshape(n, 1)
    if reduction == "mean":
        return batch_loss.mean()
    if reduction == "sum":
        return batch_loss.sum()
    return batch_loss   # 'none' (default)


def _focal_loss_ref(inputs, targets, alpha, gamma):
    p = jax.nn.softmax(inputs.astype(jnp.float32), axis=1)
    mask = jax.nn.one_hot(targets, inputs.shape[1], dtype=jnp.float32)
    probs = jnp.sum(p * mask, axis=1, keepdims=True)
    a = alpha[targets].reshape(-1, 1)
    return -a * jnp.power(1.0 - probs, gamma) * jnp.log(probs)


if __name__ == "__main__":
    key = jax.random.PRNGKey(0)
    k1, k2, k3, k4 = jax.random.split(key, 4)

    # Tolerance note: per-row contractions run on the MXU at
    # Precision.HIGHEST; 1e-3 leaves margin for MXU multi-pass f32 rounding
    # across TPU generations (observed error is ~1e-6 when fully honored).
    ATOL = RTOL = 1e-3

    # --- small case matching the module defaults (single full-array tile) ---
    N, C = 8, 16
    inputs = jax.random.normal(k1, (N, C), dtype=jnp.float32)
    targets = jax.random.randint(k2, (N,), 0, C, dtype=jnp.int32)
    alpha = jnp.ones((C,), dtype=jnp.float32)    # module default: ones(class_num, 1)
    gamma = 2.0

    out = focal_loss(inputs, targets, alpha=alpha, gamma=gamma, reduction="none")
    out = jax.block_until_ready(out)
    ref = _focal_loss_ref(inputs, targets, alpha, gamma)
    assert out.shape == (N, 1)
    assert jnp.allclose(out, ref, atol=ATOL, rtol=RTOL), (out, ref)

    # --- multi-tile + partial last block (N % tile_n != 0), non-trivial alpha ---
    N2, C2, TN = 200, 16, 128
    inputs2 = jax.random.normal(k3, (N2, C2), dtype=jnp.float32) * 3.0
    targets2 = jax.random.randint(k4, (N2,), 0, C2, dtype=jnp.int32)
    alpha2 = jnp.linspace(0.5, 1.5, C2, dtype=jnp.float32)
    out2 = focal_loss(inputs2, targets2, alpha=alpha2, gamma=gamma,
                      reduction="none", tile_n=TN)
    out2 = jax.block_until_ready(out2)
    ref2 = _focal_loss_ref(inputs2, targets2, alpha2, gamma)
    assert out2.shape == (N2, 1)
    assert jnp.allclose(out2, ref2, atol=ATOL, rtol=RTOL)

    # --- native bf16 logits streamed without any wrapper f32 upcast ---
    inputs_bf16 = inputs2.astype(jnp.bfloat16)
    out3 = jax.block_until_ready(
        focal_loss(inputs_bf16, targets2, alpha=alpha2, gamma=gamma,
                   reduction="none"))
    ref3 = _focal_loss_ref(inputs_bf16.astype(jnp.float32), targets2, alpha2, gamma)
    assert out3.shape == (N2, 1)
    assert jnp.allclose(out3, ref3, atol=ATOL, rtol=RTOL)

    # --- reduction='mean' path ---
    out_mean = jax.block_until_ready(
        focal_loss(inputs, targets, alpha=alpha, gamma=gamma, reduction="mean"))
    assert jnp.allclose(out_mean, ref.mean(), atol=ATOL, rtol=RTOL)

    print("KERNEL_OK")
</pallas_src>

<mosaic_0001>
module attributes {stable_mosaic.version = 11 : i64} {
  func.func @_focal_loss_kernel(%arg0: i32, %arg1: memref<1x16xf32, #tpu.memory_space<vmem>>, %arg2: memref<8x1xi32, #tpu.memory_space<vmem>>, %arg3: memref<8x16xf32, #tpu.memory_space<vmem>>, %arg4: memref<1x8xf32, #tpu.memory_space<vmem>>) attributes {dimension_semantics = [#tpu.dimension_semantics<parallel>], iteration_bounds = array<i64: 1>, scalar_prefetch = 0 : i64, scratch_operands = 0 : i64, tpu.core_type = #tpu.core_type<tc>, window_params = [{pipeline_mode = #tpu.pipeline_mode<synchronous>, transform_indices = @transform_0, window_bounds = array<i64: 1, 16>}, {transform_indices = @transform_1, window_bounds = array<i64: 8, 1>}, {transform_indices = @transform_2, window_bounds = array<i64: 8, 16>}, {transform_indices = @transform_3, window_bounds = array<i64: 1, 8>}]} {
    %c0 = arith.constant 0 : index
    %c0_0 = arith.constant 0 : index
    %0 = vector.load %arg3[%c0, %c0_0] : memref<8x16xf32, #tpu.memory_space<vmem>>, vector<8x16xf32>
    %c0_1 = arith.constant 0 : index
    %c0_2 = arith.constant 0 : index
    %1 = vector.load %arg2[%c0_1, %c0_2] : memref<8x1xi32, #tpu.memory_space<vmem>>, vector<8x1xi32>
    %c0_3 = arith.constant 0 : index
    %c0_4 = arith.constant 0 : index
    %2 = vector.load %arg1[%c0_3, %c0_4] : memref<1x16xf32, #tpu.memory_space<vmem>>, vector<1x16xf32>
    %3 = tpu.iota {dimensions = array<i32: 1>} : vector<8x16xi32>
    %4 = vector.broadcast %1 : vector<8x1xi32> to vector<8x16xi32>
    %5 = arith.cmpi eq, %3, %4 : vector<8x16xi32>
    %cst = arith.constant dense<0xFF800000> : vector<8xf32>
    %6 = vector.multi_reduction <maximumf>, %0, %cst [1] : vector<8x16xf32> to vector<8xf32>
    %7 = vector.shape_cast %6 : vector<8xf32> to vector<8x1xf32>
    %8 = vector.broadcast %7 : vector<8x1xf32> to vector<8x16xf32>
    %9 = arith.subf %0, %8 : vector<8x16xf32>
    %10 = math.exp %9 : vector<8x16xf32>
    %cst_5 = arith.constant 0.000000e+00 : f32
    %11 = vector.broadcast %cst_5 : f32 to vector<8x16xf32>
    %12 = arith.select %5, %9, %11 : vector<8x16xi1>, vector<8x16xf32>
    %cst_6 = arith.constant 1.000000e+00 : f32
    %cst_7 = arith.constant 0.000000e+00 : f32
    %13 = vector.broadcast %cst_6 : f32 to vector<8x16xf32>
    %14 = vector.broadcast %cst_7 : f32 to vector<8x16xf32>
    %15 = arith.select %5, %13, %14 : vector<8x16xi1>, vector<8x16xf32>
    %cst_8 = arith.constant 1.000000e+00 : f32
    %16 = vector.broadcast %cst_8 : f32 to vector<1x16xf32>
    %cst_9 = arith.constant dense<0.000000e+00> : vector<1x8xf32>
    %17 = tpu.matmul %16, %10, %cst_9 {dimension_numbers = #tpu.dot_dimension_numbers<[1], [1], [0], [0], [0, 0, 1, 0], [], []>, precision = #tpu.contract_precision<fp32>} : vector<1x16xf32>, vector<8x16xf32>, vector<1x8xf32> -> vector<1x8xf32>
    %cst_10 = arith.constant dense<0.000000e+00> : vector<1x8xf32>
    %18 = tpu.matmul %16, %12, %cst_10 {dimension_numbers = #tpu.dot_dimension_numbers<[1], [1], [0], [0], [0, 0, 1, 0], [], []>, precision = #tpu.contract_precision<fp32>} : vector<1x16xf32>, vector<8x16xf32>, vector<1x8xf32> -> vector<1x8xf32>
    %cst_11 = arith.constant dense<0.000000e+00> : vector<1x8xf32>
    %19 = tpu.matmul %2, %15, %cst_11 {dimension_numbers = #tpu.dot_dimension_numbers<[1], [1], [0], [0], [0, 0, 1, 0], [], []>, precision = #tpu.contract_precision<fp32>} : vector<1x16xf32>, vector<8x16xf32>, vector<1x8xf32> -> vector<1x8xf32>
    %20 = math.log %17 : vector<1x8xf32>
    %21 = arith.subf %18, %20 : vector<1x8xf32>
    %22 = math.exp %21 : vector<1x8xf32>
    %cst_12 = arith.constant 1.000000e+00 : f32
    %23 = vector.broadcast %cst_12 : f32 to vector<1x8xf32>
    %24 = arith.subf %23, %22 : vector<1x8xf32>
    %cst_13 = arith.constant 1.000000e+00 : f32
    %25 = vector.broadcast %cst_13 : f32 to vector<1x8xf32>
    %26 = arith.mulf %25, %24 : vector<1x8xf32>
    %27 = arith.mulf %26, %24 : vector<1x8xf32>
    %cst_14 = arith.constant 0.000000e+00 : f32
    %28 = vector.broadcast %cst_14 : f32 to vector<1x8xf32>
    %29 = arith.subf %28, %19 : vector<1x8xf32>
    %30 = arith.mulf %29, %27 : vector<1x8xf32>
    %31 = arith.mulf %30, %21 : vector<1x8xf32>
    %c0_15 = arith.constant 0 : index
    %c0_16 = arith.constant 0 : index
    %32 = vector.load %arg4[%c0_15, %c0_16] : memref<1x8xf32, #tpu.memory_space<vmem>>, vector<1x8xf32>
    tpu.vector_store %arg4[%c0_15, %c0_16], %31 {strides = array<i32>} : memref<1x8xf32, #tpu.memory_space<vmem>>, vector<1x8xf32>,
    return
  }
  func.func @transform_0(%arg0: i32) -> (i32, i32) {
    %c0_i32 = arith.constant 0 : i32
    %c0_i32_0 = arith.constant 0 : i32
    %c0_i32_1 = arith.constant 0 : i32
    return %c0_i32, %c0_i32_0 : i32, i32
  }
  func.func @transform_1(%arg0: i32) -> (i32, i32) {
    %c0_i32 = arith.constant 0 : i32
    %c0_i32_0 = arith.constant 0 : i32
    return %arg0, %c0_i32 : i32, i32
  }
  func.func @transform_2(%arg0: i32) -> (i32, i32) {
    %c0_i32 = arith.constant 0 : i32
    %c0_i32_0 = arith.constant 0 : i32
    return %arg0, %c0_i32 : i32, i32
  }
  func.func @transform_3(%arg0: i32) -> (i32, i32) {
    %c0_i32 = arith.constant 0 : i32
    %c0_i32_0 = arith.constant 0 : i32
    return %c0_i32, %arg0 : i32, i32
  }
}

</mosaic_0001>

<bundles_post_ra>
// kernel: tpu_custom_call.1
= control target key start
LH: loop header
LB: loop body
LE: loop exit
PB: predicated region body
PF: predicated region fallthrough
CT: control target
= control target key end

     0   :  { %vm24_vm0 = vcmask 130048   ;;  %s611_s0 = inlined_call_operand.vmem [shape: f32[1,16], index: 0, kind: input, shape index: {}]   ;;  %s612_s1 = inlined_call_operand.vmem [shape: s32[8,1], index: 1, kind: input, shape index: {}]   ;;  %s613_s2 = inlined_call_operand.vmem [shape: f32[8,16], index: 2, kind: input, shape index: {}]   ;;  %s614_s3 = inlined_call_operand.hbm [shape: f32[1,8], index: 3, kind: output, shape index: {}]  }
   0x1   :  { %v15_v0 = vld [vmem:[%s613_s2] sm:$0xff] }
   0x2   :  { %8 = vsyncpa [#allocation3], 0  ;;  %v25_v1 = vsel %vm24_vm0, %v15_v0, -inf  ;;  %v560_v2 = vmov 0   ;;  %v16_v3 = vld [vmem:[%s612_s1] sm:$0xff]  ;;  %v18_v13 = vlaneseq  ;;  %v561_v24 = vmov 0.0  }
   0x3   :  { %527 = vset.pattern.permute.xlu0 %v560_v2  ;;  %v34_v4 = vsel %vm24_vm0, 1.0, %v560_v2  ;;  %v17_v18 = vld [vmem:[%s611_s0] sm:$0x1]  ;;  %v562_v34 = vmov 1.0   ;;  %s563_s0 = smov [#allocation2]   ;;  %s505_s19 = sshll.u32 %s614_s3, 4  ;;  %s506_s19 = int_to_ptr.hbm [resolvable:$true] %s505_s19 }
   0x4   :  { %26 = vmax.xlane.f32.xlu0 %v25_v1  ;;  %v57_v7 = vsub.f32 %v34_v4, %v34_v4  ;;  %v19_v17 = vand.u32 127, %v18_v13  ;;  %v335_v22 = vsel %vm24_vm0, %v17_v18, 0  ;;  %s503_s16 = sshll.u32 %s563_s0, 4  ;;  %vm496_vm2 = vcmask 57344   ;;  %s504_s16 = int_to_ptr.vmem [resolvable:$true] %s503_s16 }
   0x5   :  { %v357_v29 = vand.u32 4294901760, %v335_v22 }
   0x6   :  { %v58_v9 = vand.u32 4294901760, %v57_v7 }
   0x7   :  { %v358_v35 = vsub.f32 %v335_v22, %v357_v29 }
   0x8   :  { %v59_v10 = vsub.f32 %v57_v7, %v58_v9 }
   0x9   :  { %v359_v39 = vand.u32 4294901760, %v358_v35 }
   0xa   :  { %v60_v15 = vand.u32 4294901760, %v59_v10 }
   0xb   :  { %v360_v42 = vsub.f32 %v358_v35, %v359_v39 }
   0xd   :  { %v361_v43 = vand.u32 4294901760, %v360_v42 }
  0x18   :  { %21 = vperm.xlu0 %527, %v16_v3  }
  0x77   :  { %v27_v5 = vpop.xlane.xlu0 %26 }
  0x78   :  { %v28_v6 = vsub.f32 %v15_v0, %v27_v5 }
  0x7a   :  { %v29_v8 = vmul.f32 1.442695, %v28_v6 }
  0x7c   :  { %528 = vpow2.f32 %v29_v8 }
  0x82   :  { %v529_v11 = vpop.eup %528 }
  0x83   :  { %v37_v12 = vsel %vm24_vm0, %v529_v11, 0 }
  0x84   :  { %v54_v14 = vand.u32 4294901760, %v37_v12 }
  0x86   :  { %55 = vmatpush.xpose.msra.mxu0 %v54_v14  ;;  %131 = vmatpush.xpose.msra.mxu3 %v54_v14  ;;  %v81_v16 = vsub.f32 %v37_v12, %v54_v14 }
  0x88   :  { %108 = vmatpush.xpose.msra.mxu2 %v81_v16  ;;  %v82_v19 = vand.u32 4294901760, %v81_v16 }
  0x89   :  { %61 = vmatmul.f32.vlgmr.msra.gmra.mxu0 %v60_v15  ;;  %135 = vmatmul.f32.vlgmr.msra.gmra.mxu3 %v58_v9 }
  0x8a   :  { %157 = vmatpush.xpose.msrb.mxu0 %v82_v19  ;;  %v22_v20 = vpop.permute.xlu0 %21  ;;  %v83_v21 = vsub.f32 %v81_v16, %v82_v19 }
  0x8b   :  { %vm23_vm1 = vcmp.eq.s32.totalorder %v19_v17, %v22_v20  ;;  %111 = vmatmul.f32.vlgmr.msra.gmra.mxu2 %v57_v7 }
  0x8c   :  { %v31_v23 = vsel %vm23_vm1, %v28_v6, 0.0  ;;  %v32_v25 = vsel %vm23_vm1, 1.0, %v561_v24  ;;  %v84_v26 = vand.u32 4294901760, %v83_v21 }
  0x8d   :  { %v186_v27 = vsel %vm24_vm0, %v31_v23, 0  ;;  %v338_v28 = vsel %vm24_vm0, %v32_v25, 0 }
  0x8e   :  { %v203_v30 = vand.u32 4294901760, %v186_v27  ;;  %v382_v31 = vsub.f32 %v338_v28, %v338_v28  ;;  %85 = vmatpush.xpose.msra.mxu1 %v84_v26 }
  0x90   :  { %v230_v32 = vsub.f32 %v186_v27, %v203_v30  ;;  %204 = vmatpush.xpose.msrb.mxu2 %v203_v30  ;;  %v383_v33 = vand.u32 4294901760, %v382_v31 }
  0x91   :  { %514 = vmatmul.msk.f32.vlgmr.msra.gmra.mxu1 %vm24_vm0, %v562_v34  ;;  %515 = vmatmul.msk.f32.vlgmr.msrb.gmra.mxu0 %vm24_vm0, %v562_v34 }
  0x92   :  { %179 = vmatpush.xpose.msrb.mxu1 %v54_v14  ;;  %257 = vmatpush.xpose.msra.mxu0 %v230_v32  ;;  %v231_v36 = vand.u32 4294901760, %v230_v32  ;;  %v384_v38 = vsub.f32 %v382_v31, %v383_v33 }
  0x93   :  { %210 = vmatmul.f32.vlgmr.msrb.gmra.mxu2 %v60_v15 }
  0x94   :  { %306 = vmatpush.xpose.msra.mxu2 %v231_v36  ;;  %v232_v37 = vsub.f32 %v230_v32, %v231_v36  ;;  %v385_v41 = vand.u32 4294901760, %v384_v38 }
  0x96   :  { %280 = vmatpush.xpose.msra.mxu1 %v203_v30  ;;  %520 = vmatpush.xpose.msk.msrb.mxu0 %vm24_vm0, %v32_v25  ;;  %v233_v40 = vand.u32 4294901760, %v232_v37 }
  0x98   :  { %409 = vmatpush.xpose.msrb.mxu2 %v382_v31  ;;  %234 = vmatpush.xpose.msrb.mxu3 %v233_v40 }
  0x99   :  { %516 = vmatmul.msk.f32.vlgmr.msrb.gmra.mxu1 %vm24_vm0, %v562_v34  ;;  %260 = vmatmul.f32.vlgmr.msra.gmra.mxu0 %v57_v7 }
  0x9a   :  { %386 = vmatpush.xpose.msrb.mxu1 %v385_v41  ;;  %458 = vmatpush.xpose.msra.mxu0 %v383_v33 }
  0x9b   :  { %517 = vmatmul.msk.f32.vlgmr.msrb.gmra.mxu3 %vm24_vm0, %v562_v34  ;;  %518 = vmatmul.msk.f32.vlgmr.msra.gmra.mxu2 %vm24_vm0, %v562_v34 }
  0x9c   :  { %328 = vmatpush.xpose.msra.mxu3 %v203_v30 }
  0xa0   :  { %521 = vmatpush.xpose.msk.msrb.mxu3 %vm24_vm0, %v32_v25 }
  0xa1   :  { %284 = vmatmul.f32.vlgmr.msra.gmra.mxu1 %v58_v9  ;;  %362 = vmatmul.f32.vlgmr.msrb.gmra.mxu0 %v361_v43 }
  0xa2   :  { %522 = vmatpush.xpose.msk.msra.mxu1 %vm24_vm0, %v32_v25 }
  0xa3   :  { %519 = vmatmul.msk.f32.vlgmr.msra.gmra.mxu3 %vm24_vm0, %v562_v34  ;;  %412 = vmatmul.f32.vlgmr.msrb.gmra.mxu2 %v358_v35 }
  0xa9   :  { %388 = vmatmul.f32.vlgmr.msrb.gmra.mxu1 %v357_v29  ;;  %460 = vmatmul.f32.vlgmr.msra.gmra.mxu0 %v357_v29 }
  0xab   :  { %436 = vmatmul.f32.vlgmr.msrb.gmra.mxu3 %v359_v39 }
  0xb1   :  { %482 = vmatmul.f32.vlgmr.msra.gmra.mxu1 %v357_v29 }
 0x106   :  { %v62_v44 = vpop.f32.mrf.mxu0 }
 0x10c   :  { %v136_v48 = vpop.f32.mrf.mxu3 }
 0x10e   :  { %v88_v45 = vpop.f32.mrf.mxu1  ;;  %v112_v46 = vpop.f32.mrf.mxu2 }
 0x10f   :  { %v89_v47 = vadd.f32 %v88_v45, %v62_v44  ;;  %v160_v50 = vpop.f32.mrf.mxu0 }
 0x111   :  { %v113_v49 = vadd.f32 %v112_v46, %v89_v47 }
 0x113   :  { %v137_v51 = vadd.f32 %v136_v48, %v113_v49 }
 0x115   :  { %v161_v52 = vadd.f32 %v160_v50, %v137_v51 }
 0x116   :  { %v182_v53 = vpop.f32.mrf.mxu1  ;;  %v211_v54 = vpop.f32.mrf.mxu2 }
 0x117   :  { %v183_v55 = vadd.f32 %v182_v53, %v161_v52  ;;  %v261_v56 = vpop.f32.mrf.mxu0 }
 0x119   :  { %530 = vlog2.f32 %v183_v55 }
 0x11e   :  { %v237_v57 = vpop.f32.mrf.mxu3  ;;  %v285_v58 = vpop.f32.mrf.mxu1 }
 0x11f   :  { %v238_v59 = vadd.f32 %v237_v57, %v211_v54  ;;  %v309_v60 = vpop.f32.mrf.mxu2  ;;  %v531_v63 = vpop.eup %530 }
 0x120   :  { %v363_v0 = vpop.f32.mrf.mxu0  ;;  %v487_v4 = vmul.f32 0.6931472, %v531_v63 }
 0x121   :  { %v262_v61 = vadd.f32 %v261_v56, %v238_v59 }
 0x123   :  { %v286_v62 = vadd.f32 %v285_v58, %v262_v61 }
 0x125   :  { %v310_v1 = vadd.f32 %v309_v60, %v286_v62 }
 0x126   :  { %v331_v2 = vpop.f32.mrf.mxu3  ;;  %v389_v3 = vpop.f32.mrf.mxu1 }
 0x127   :  { %v332_v5 = vadd.f32 %v331_v2, %v310_v1  ;;  %v390_v6 = vadd.f32 %v389_v3, %v363_v0  ;;  %v413_v7 = vpop.f32.mrf.mxu2 }
 0x128   :  { %v461_v12 = vpop.f32.mrf.mxu0 }
 0x129   :  { %v488_v8 = vsub.f32 %v332_v5, %v487_v4  ;;  %v414_v10 = vadd.f32 %v413_v7, %v390_v6 }
 0x12b   :  { %v489_v9 = vmul.f32 1.442695, %v488_v8 }
 0x12d   :  { %532 = vpow2.f32 %v489_v9 }
 0x12e   :  { %v437_v11 = vpop.f32.mrf.mxu3  ;;  %v483_v14 = vpop.f32.mrf.mxu1 }
 0x12f   :  { %v438_v13 = vadd.f32 %v437_v11, %v414_v10 }
 0x131   :  { %v462_v15 = vadd.f32 %v461_v12, %v438_v13 }
 0x133   :  { %v533_v16 = vpop.eup %532  ;;  %v484_v17 = vadd.f32 %v483_v14, %v462_v15 }
 0x134   :  { %v491_v18 = vsub.f32 1.0, %v533_v16 }
 0x135   :  { %v493_v19 = vsub.f32 0.0, %v484_v17 }
 0x136   :  { %v492_v20 = vmul.f32 %v491_v18, %v491_v18 }
 0x138   :  { %v494_v21 = vmul.f32 %v493_v19, %v492_v20 }
 0x13a   :  { %v495_v22 = vmul.f32 %v494_v21, %v488_v8 }
 0x13c   :  { %497 = vst.msk [vmem:[#allocation2] sm:$0x1] %vm496_vm2, %v495_v22 }
 0x13d   :  { %508 = dma.vmem_to_hbm [thread:$0]  %s504_s16, 16, %s506_s19, [#allocation3]  }
 0x13e   :  { %558 = dma.done.wait [#allocation3], 16  }
 0x13f   :  { %559 = vsyncadd [#allocation3], 4294967280 }
 0x140   :  { %513 = vsyncpa [#allocation3], 1 }

</bundles_post_ra>
